<compile_context>
chip_gen: v7x
topology: tpu7x:2x2x1
jax: 0.10.0
libtpu: 0.0.40
codegen_flags: <defaults>
</compile_context>

<pallas_src>
import functools
import math

import jax
import jax.numpy as jnp
from jax.experimental import pallas as pl
from jax.experimental.pallas import tpu as pltpu


def _round_up(n, m):
    return ((n + m - 1) // m) * m


def _decoder_kernel(xf_ref, w_ref, b_ref, coord_ref, conf_ref, *,
                    coord_dim, conf_offset, num_modes):
    # xf_ref:    (TB, T*E)  lane-dense flattened input rows
    # w_ref:     (T*E, Cp)  fused folded weight (mean folded in; conf head at conf_offset)
    # b_ref:     (1, Cp)    fused bias (f32)
    # coord_ref: (TB, coord_dim)  unpadded coord head output
    # conf_ref:  (TB, num_modes)  softmaxed confidences
    out = jnp.dot(xf_ref[...], w_ref[...], preferred_element_type=jnp.float32)
    out = out + b_ref[...]                                     # (TB, Cp) f32

    # Coordinate head: dense leading columns -> unpadded store (wrapper reshape is free).
    coord_ref[...] = out[:, :coord_dim].astype(coord_ref.dtype)

    # Confidence head at a 128-aligned column offset -> cheap aligned lane slice,
    # then a numerically-stable softmax over the modes (EUP exp).
    logits = out[:, conf_offset:conf_offset + num_modes]
    m = jnp.max(logits, axis=-1, keepdims=True)
    e = jnp.exp(logits - m)
    conf_ref[...] = (e / jnp.sum(e, axis=-1, keepdims=True)).astype(conf_ref.dtype)


def _choose_batch_tile(bs, cap):
    """Pick (tile, padded_bs): tile legal for Pallas, avoiding input-padding copies."""
    cap = max(8, _round_up(cap, 8))
    if bs <= cap:
        return bs, bs                       # single full-dim block: always legal, no pad
    # Keep >= 4 grid steps so both v7x TensorCores get pipelined work.
    cap = min(cap, max(8, _round_up(-(-bs // 4), 8)))
    tb_div = 0
    for tb in range(cap, 7, -8):            # largest multiple-of-8 divisor of bs <= cap
        if bs % tb == 0:
            tb_div = tb
            break
    if tb_div and tb_div * 2 >= cap:
        return tb_div, bs                    # divides exactly -> no padding copy of x
    return cap, _round_up(bs, cap)           # fall back: pad the batch


def avg_pool_decoder_forward(x, w, b, *, num_modes=3, future_steps=50, tile_b=1024):
    """x: (bs, T, n_emb); w: (output_size, n_emb) (PyTorch Linear layout); b: (output_size,).

    Returns (coord_pred: (bs, num_modes, future_steps, 2), conf: (bs, num_modes)).
    """
    bs, T, E = x.shape
    out_dim, in_dim = w.shape
    assert in_dim == E
    K = num_modes
    CD = num_modes * future_steps * 2
    assert out_dim >= CD + K
    TE = T * E

    # Fused folded weight: mean folded in (tile W/T along the input dim); conf head placed
    # at a 128-aligned output column so both heads come out of ONE aligned matmul.
    conf_off = _round_up(CD, 128)
    Cp = conf_off + _round_up(K, 128)
    w32 = w.astype(jnp.float32)
    w_small = jnp.zeros((E, Cp), jnp.float32)
    w_small = w_small.at[:, :CD].set(w32[:CD, :].T / T)
    w_small = w_small.at[:, conf_off:conf_off + K].set(w32[out_dim - K:, :].T / T)
    w_fused = jnp.tile(w_small, (T, 1)).astype(x.dtype)          # (T*E, Cp)
    b32 = b.astype(jnp.float32)
    b_fused = jnp.zeros((1, Cp), jnp.float32)
    b_fused = b_fused.at[0, :CD].set(b32[:CD])
    b_fused = b_fused.at[0, conf_off:conf_off + K].set(b32[out_dim - K:])

    # Lane-dense input: (bs, T*E) is a free row-major reshape of x.
    x_flat = x.reshape(bs, TE)
    item = jnp.dtype(x.dtype).itemsize
    out_dtype = x.dtype

    # Batch tile: large (amortizes ~0.35us per-step overhead) but VMEM-bounded, and an
    # exact divisor of bs when possible (no jnp.pad copy of the input).
    per_row_vmem = (2 * TE * item                                         # x tile (2-buf)
                    + 2 * (_round_up(CD, 128) + _round_up(K, 128)) * item  # out tiles (2-buf)
                    + 2 * Cp * 4)                                          # f32 temporaries
    vmem_row_cap = max(8, ((36 * 2**20) // max(per_row_vmem, 1)) // 8 * 8)
    tb, padded_bs = _choose_batch_tile(bs, min(tile_b, vmem_row_cap))
    if padded_bs != bs:
        x_flat = jnp.pad(x_flat, ((0, padded_bs - bs), (0, 0)))
    grid = (padded_bs // tb,)

    # VMEM plan (all buffers lane-dense), capped well under the v7x 64 MiB physical budget.
    need = (2 * tb * TE * item
            + 2 * (TE * Cp * item + Cp * 4)
            + 2 * tb * (_round_up(CD, 128) + _round_up(K, 128)) * item
            + 2 * tb * Cp * 4)
    vmem_limit = int(min(48 * 2**20, max(16 * 2**20, 2 * need)))

    cost = pl.CostEstimate(
        flops=int(2 * padded_bs * TE * Cp + 6 * padded_bs * K),
        transcendentals=int(padded_bs * K),
        bytes_accessed=int(x_flat.size * item + w_fused.size * item + Cp * 4
                           + padded_bs * (CD + K) * jnp.dtype(out_dtype).itemsize),
    )

    kernel = functools.partial(_decoder_kernel, coord_dim=CD,
                               conf_offset=conf_off, num_modes=K)

    coord, conf = pl.pallas_call(
        kernel,
        out_shape=(
            jax.ShapeDtypeStruct((padded_bs, CD), out_dtype),   # unpadded -> free reshape
            jax.ShapeDtypeStruct((padded_bs, K), out_dtype),
        ),
        grid_spec=pltpu.PrefetchScalarGridSpec(
            num_scalar_prefetch=0,
            grid=grid,
            in_specs=[
                pl.BlockSpec((tb, TE), lambda i: (i, 0)),       # lane-dense x tile
                pl.BlockSpec((TE, Cp), lambda i: (0, 0)),       # fused weight (resident)
                pl.BlockSpec((1, Cp), lambda i: (0, 0)),        # fused bias (resident)
            ],
            out_specs=[
                pl.BlockSpec((tb, CD), lambda i: (i, 0)),       # coord head
                pl.BlockSpec((tb, K), lambda i: (i, 0)),        # softmaxed confidences
            ],
        ),
        compiler_params=pltpu.CompilerParams(
            dimension_semantics=("parallel",),
            vmem_limit_bytes=vmem_limit,
        ),
        cost_estimate=cost,
    )(x_flat, w_fused, b_fused)

    if padded_bs != bs:
        coord = coord[:bs]
        conf = conf[:bs]
    # Pure-layout epilogue: row-major reshape of an unpadded (bs, CD) array is a free view.
    return coord.reshape(bs, num_modes, future_steps, 2), conf


def _reference(x, w, b, num_modes, future_steps):
    bs = x.shape[0]
    pooled = jnp.mean(x, axis=1)
    t = pooled @ w.T + b
    coord = t[:, :num_modes * future_steps * 2].reshape(bs, num_modes, future_steps, 2)
    conf = jax.nn.softmax(t[:, -num_modes:], axis=-1)
    return coord, conf


if __name__ == "__main__":
    # Small config consistent with the module: bs=2, T=8, n_emb=32,
    # num_modes=3, future_steps=50, output_size = 3*50*2 + 3 = 303.
    num_modes, future_steps = 3, 50
    bs, T, n_emb = 2, 8, 32
    output_size = num_modes * future_steps * 2 + num_modes

    key = jax.random.PRNGKey(0)
    kx, kw, kb = jax.random.split(key, 3)

    x = jax.random.normal(kx, (bs, T, n_emb), dtype=jnp.float32)
    bound = 1.0 / math.sqrt(n_emb)
    w = jax.random.uniform(kw, (output_size, n_emb), jnp.float32, -bound, bound)
    b = jax.random.uniform(kb, (output_size,), jnp.float32, -bound, bound)

    coord, conf = avg_pool_decoder_forward(
        x, w, b, num_modes=num_modes, future_steps=future_steps)
    coord = jax.block_until_ready(coord)
    conf = jax.block_until_ready(conf)

    ref_coord, ref_conf = _reference(x, w, b, num_modes, future_steps)
    assert coord.shape == (bs, num_modes, future_steps, 2)
    assert conf.shape == (bs, num_modes)
    assert jnp.allclose(coord, ref_coord, atol=1e-4, rtol=1e-4), "coord mismatch"
    assert jnp.allclose(conf, ref_conf, atol=1e-5, rtol=1e-5), "conf mismatch"
    assert jnp.allclose(jnp.sum(conf, axis=1), 1.0, atol=1e-5), "softmax not normalized"

    print("KERNEL_OK")
</pallas_src>

<mosaic_0001>
module attributes {stable_mosaic.version = 11 : i64} {
  func.func @_decoder_kernel(%arg0: i32, %arg1: memref<2x256xf32, #tpu.memory_space<vmem>>, %arg2: memref<256x512xf32, #tpu.memory_space<vmem>>, %arg3: memref<1x512xf32, #tpu.memory_space<vmem>>, %arg4: memref<2x300xf32, #tpu.memory_space<vmem>>, %arg5: memref<2x3xf32, #tpu.memory_space<vmem>>) attributes {dimension_semantics = [#tpu.dimension_semantics<parallel>], iteration_bounds = array<i64: 1>, scalar_prefetch = 0 : i64, scratch_operands = 0 : i64, tpu.core_type = #tpu.core_type<tc>, window_params = [{transform_indices = @transform_0, window_bounds = array<i64: 2, 256>}, {pipeline_mode = #tpu.pipeline_mode<synchronous>, transform_indices = @transform_1, window_bounds = array<i64: 256, 512>}, {pipeline_mode = #tpu.pipeline_mode<synchronous>, transform_indices = @transform_2, window_bounds = array<i64: 1, 512>}, {transform_indices = @transform_3, window_bounds = array<i64: 2, 300>}, {transform_indices = @transform_4, window_bounds = array<i64: 2, 3>}]} {
    %c0 = arith.constant 0 : index
    %c0_0 = arith.constant 0 : index
    %0 = vector.load %arg1[%c0, %c0_0] : memref<2x256xf32, #tpu.memory_space<vmem>>, vector<2x256xf32>
    %c0_1 = arith.constant 0 : index
    %c0_2 = arith.constant 0 : index
    %1 = vector.load %arg2[%c0_1, %c0_2] : memref<256x512xf32, #tpu.memory_space<vmem>>, vector<256x512xf32>
    %cst = arith.constant dense<0.000000e+00> : vector<2x512xf32>
    %2 = tpu.matmul %0, %1, %cst {dimension_numbers = #tpu.dot_dimension_numbers<[1], [0], [0], [1], [0, 0, 1, 1], [], []>} : vector<2x256xf32>, vector<256x512xf32>, vector<2x512xf32> -> vector<2x512xf32>
    %c0_3 = arith.constant 0 : index
    %c0_4 = arith.constant 0 : index
    %3 = vector.load %arg3[%c0_3, %c0_4] : memref<1x512xf32, #tpu.memory_space<vmem>>, vector<1x512xf32>
    %4 = vector.broadcast %3 : vector<1x512xf32> to vector<2x512xf32>
    %5 = arith.addf %2, %4 : vector<2x512xf32>
    %6 = vector.extract_strided_slice %5 {offsets = [0, 0], sizes = [2, 300], strides = [1, 1]} : vector<2x512xf32> to vector<2x300xf32>
    %c0_5 = arith.constant 0 : index
    %c0_6 = arith.constant 0 : index
    %7 = vector.load %arg4[%c0_5, %c0_6] : memref<2x300xf32, #tpu.memory_space<vmem>>, vector<2x300xf32>
    tpu.vector_store %arg4[%c0_5, %c0_6], %6 {strides = array<i32>} : memref<2x300xf32, #tpu.memory_space<vmem>>, vector<2x300xf32>,
    %8 = vector.extract_strided_slice %5 {offsets = [0, 384], sizes = [2, 3], strides = [1, 1]} : vector<2x512xf32> to vector<2x3xf32>
    %cst_7 = arith.constant dense<0xFF800000> : vector<2xf32>
    %9 = vector.multi_reduction <maximumf>, %8, %cst_7 [1] : vector<2x3xf32> to vector<2xf32>
    %10 = vector.shape_cast %9 : vector<2xf32> to vector<2x1xf32>
    %11 = vector.broadcast %10 : vector<2x1xf32> to vector<2x3xf32>
    %12 = arith.subf %8, %11 : vector<2x3xf32>
    %13 = math.exp %12 : vector<2x3xf32>
    %cst_8 = arith.constant dense<0.000000e+00> : vector<2xf32>
    %14 = vector.multi_reduction <add>, %13, %cst_8 [1] : vector<2x3xf32> to vector<2xf32>
    %15 = vector.shape_cast %14 : vector<2xf32> to vector<2x1xf32>
    %16 = vector.broadcast %15 : vector<2x1xf32> to vector<2x3xf32>
    %17 = arith.divf %13, %16 : vector<2x3xf32>
    %c0_9 = arith.constant 0 : index
    %c0_10 = arith.constant 0 : index
    %18 = vector.load %arg5[%c0_9, %c0_10] : memref<2x3xf32, #tpu.memory_space<vmem>>, vector<2x3xf32>
    tpu.vector_store %arg5[%c0_9, %c0_10], %17 {strides = array<i32>} : memref<2x3xf32, #tpu.memory_space<vmem>>, vector<2x3xf32>,
    return
  }
  func.func @transform_0(%arg0: i32) -> (i32, i32) {
    %c0_i32 = arith.constant 0 : i32
    %c0_i32_0 = arith.constant 0 : i32
    return %arg0, %c0_i32 : i32, i32
  }
  func.func @transform_1(%arg0: i32) -> (i32, i32) {
    %c0_i32 = arith.constant 0 : i32
    %c0_i32_0 = arith.constant 0 : i32
    %c0_i32_1 = arith.constant 0 : i32
    return %c0_i32, %c0_i32_0 : i32, i32
  }
  func.func @transform_2(%arg0: i32) -> (i32, i32) {
    %c0_i32 = arith.constant 0 : i32
    %c0_i32_0 = arith.constant 0 : i32
    %c0_i32_1 = arith.constant 0 : i32
    return %c0_i32, %c0_i32_0 : i32, i32
  }
  func.func @transform_3(%arg0: i32) -> (i32, i32) {
    %c0_i32 = arith.constant 0 : i32
    %c0_i32_0 = arith.constant 0 : i32
    return %arg0, %c0_i32 : i32, i32
  }
  func.func @transform_4(%arg0: i32) -> (i32, i32) {
    %c0_i32 = arith.constant 0 : i32
    %c0_i32_0 = arith.constant 0 : i32
    return %arg0, %c0_i32 : i32, i32
  }
}

</mosaic_0001>

<bundles_post_ra>
// kernel: tpu_custom_call.1
= control target key start
LH: loop header
LB: loop body
LE: loop exit
PB: predicated region body
PF: predicated region fallthrough
CT: control target
= control target key end

     0   :  { %10 = vsyncpa [#allocation3], 0  ;;  %s752_s0 = inlined_call_operand.hbm [shape: f32[2,256], index: 0, kind: input, shape index: {}]   ;;  %s753_s1 = inlined_call_operand.hbm [shape: f32[256,512], index: 1, kind: input, shape index: {}]   ;;  %s754_s2 = inlined_call_operand.vmem [shape: f32[1,512], index: 2, kind: input, shape index: {}]   ;;  %s755_s3 = inlined_call_operand.hbm [shape: f32[2,300], index: 3, kind: output, shape index: {0}]   ;;  %s756_s4 = inlined_call_operand.hbm [shape: f32[2,3], index: 4, kind: output, shape index: {1}]  }
   0x1   :  { %11 = vsyncpa [#allocation6], 0 }
   0x2   :  { %12 = vsyncpa [#allocation4], 0 }
   0x3   :  { %13 = vsyncpa [#allocation9], 0  ;;  %s653_s15 = smov [#allocation2]   ;;  %s654_s17 = smov [#allocation5]  }
   0x4   :  { %s20_s16 = sshll.u32 %s653_s15, 4  ;;  %s29_s18 = sshll.u32 %s654_s17, 4  ;;  %s21_s16 = int_to_ptr.vmem [resolvable:$true] %s20_s16  ;;  %s685_s18 = int_to_ptr.vmem [resolvable:$true] %s29_s18 }
   0x5   :  { %s557_s21 = scalar_lea.hbm %s752_s0, 64 }
   0x6   :  { %p558_p0 = scmp.ne.s32.totalorder %s752_s0, %s557_s21  ;;  %p561_p1 = scmp.lt.u32.totalorder %s557_s21, %s752_s0 }
   0x8   :  { %p563_p2 = pnand %p561_p1, %p558_p0 }
   0xa   :  { %566 = shalt.err (!%p563_p2)
}
   0xb   :  { %s567_s26 = scalar_lea.vmem %s21_s16, 64  ;;  %p572_p4 = scmp.lt.s32.totalorder %s21_s16, %s21_s16 }
   0xc   :  { %p568_p3 = scmp.ne.s32.totalorder %s21_s16, %s567_s26  ;;  %p573_p5 = scmp.lt.s32.totalorder %s567_s26, %s567_s26 }
   0xe   :  { %p574_p6 = por %p573_p5, %p572_p4 }
  0x10   :  { %p575_p7 = pnand %p574_p6, %p568_p3 }
  0x12   :  { %578 = shalt.err (!%p575_p7)
}
  0x13   :  { %23 = dma.hbm_to_vmem [thread:$0]  %s752_s0, 64, %s21_s16, [#allocation3]  }
  0x14   :  { %s579_s5 = scalar_lea.hbm %s753_s1, 16384 }
  0x15   :  { %p580_p8 = scmp.ne.s32.totalorder %s753_s1, %s579_s5  ;;  %p583_p9 = scmp.lt.u32.totalorder %s579_s5, %s753_s1 }
  0x17   :  { %p585_p10 = pnand %p583_p9, %p580_p8 }
  0x19   :  { %588 = shalt.err (!%p585_p10)
}
  0x1a   :  { %s589_s10 = scalar_lea.vmem %s685_s18, 16384  ;;  %p594_p12 = scmp.lt.s32.totalorder %s685_s18, %s685_s18 }
  0x1b   :  { %p590_p11 = scmp.ne.s32.totalorder %s685_s18, %s589_s10  ;;  %p595_p13 = scmp.lt.s32.totalorder %s589_s10, %s589_s10 }
  0x1d   :  { %p596_p0 = por %p595_p13, %p594_p12 }
  0x1f   :  { %p597_p1 = pnand %p596_p0, %p590_p11 }
  0x21   :  { %600 = shalt.err (!%p597_p1)
}
  0x22   :  { %s655_s0 = smov 512   ;;  %s656_s11 = smov 32  }
  0x23   :  { %35 = dma.hbm_to_vmem [thread:$0]  %s753_s1, 16384, %s685_s18, [#allocation6], %s655_s0, %s655_s0, %s656_s11  }
  0x24   :  { %645 = dma.done.wait [#allocation3], 64  }
  0x25   :  { %646 = vsyncadd [#allocation3], 4294967232 }
  0x26   :  { %647 = dma.done.wait [#allocation6], 16384  }
  0x27   :  { %648 = vsyncadd [#allocation6], 4294950912  ;;  %v46_v0 = vld [vmem:[#allocation5 + $0x8] sm:$0xff]  ;;  %v48_v2 = vld [vmem:[#allocation5 + $0x18] sm:$0xff]  ;;  %vm368_vm0 = vcmask 1041408   ;;  %vm369_vm1 = vcmask 1043458  }
  0x28   :  { %v50_v1 = vld [vmem:[#allocation5 + $0x28] sm:$0xff]  ;;  %v52_v4 = vld [vmem:[#allocation5 + $0x38] sm:$0xff]  ;;  %v45_v5 = vld [vmem:[#allocation5] sm:$0xff]  ;;  %vm374_vm2 = vcmask 17408   ;;  %vm371_vm4 = vcmask 357380  }
  0x29   :  { %v418_v3 = vpack.c.bf16 %v50_v1, %v46_v0  ;;  %v49_v6 = vld [vmem:[#allocation5 + $0x20] sm:$0xff]  ;;  %v482_v7 = vpack.c.bf16 %v52_v4, %v48_v2  ;;  %v47_v9 = vld [vmem:[#allocation5 + $0x10] sm:$0xff]  ;;  %v54_v11 = vld [vmem:[#allocation5 + $0x48] sm:$0xff] }
  0x2a   :  { %v420_v8 = vpack.c.bf16 %v49_v6, %v45_v5  ;;  %v51_v10 = vld [vmem:[#allocation5 + $0x30] sm:$0xff]  ;;  %v58_v13 = vld [vmem:[#allocation5 + $0x68] sm:$0xff]  ;;  %v56_v14 = vld [vmem:[#allocation5 + $0x58] sm:$0xff] }
  0x2b   :  { %419 = vmatprep.subr.bf16.mxu0 %v418_v3  ;;  %v484_v12 = vpack.c.bf16 %v51_v10, %v47_v9  ;;  %v60_v15 = vld [vmem:[#allocation5 + $0x78] sm:$0xff]  ;;  %483 = vmatprep.subr.bf16.mxu1 %v482_v7  ;;  %v422_v16 = vpack.c.bf16 %v58_v13, %v54_v11  ;;  %v53_v18 = vld [vmem:[#allocation5 + $0x40] sm:$0xff]  ;;  %v55_v20 = vld [vmem:[#allocation5 + $0x50] sm:$0xff] }
  0x2c   :  { %421 = vmatpush1.bf16.msra.mxu0 %v420_v8  ;;  %v486_v17 = vpack.c.bf16 %v60_v15, %v56_v14  ;;  %v57_v19 = vld [vmem:[#allocation5 + $0x60] sm:$0xff]  ;;  %v59_v22 = vld [vmem:[#allocation5 + $0x70] sm:$0xff]  ;;  %v62_v23 = vld [vmem:[#allocation5 + $0x88] sm:$0xff] }
  0x2d   :  { %485 = vmatpush1.bf16.msra.mxu1 %v484_v12  ;;  %v424_v21 = vpack.c.bf16 %v57_v19, %v53_v18  ;;  %v66_v24 = vld [vmem:[#allocation5 + $0xa8] sm:$0xff]  ;;  %423 = vmatprep.subr.bf16.mxu0 %v422_v16  ;;  %v488_v25 = vpack.c.bf16 %v59_v22, %v55_v20  ;;  %v64_v27 = vld [vmem:[#allocation5 + $0x98] sm:$0xff]  ;;  %v61_v29 = vld [vmem:[#allocation5 + $0x80] sm:$0xff] }
  0x2e   :  { %487 = vmatprep.subr.bf16.mxu1 %v486_v17  ;;  %v426_v26 = vpack.c.bf16 %v66_v24, %v62_v23  ;;  %v68_v28 = vld [vmem:[#allocation5 + $0xb8] sm:$0xff]  ;;  %v65_v31 = vld [vmem:[#allocation5 + $0xa0] sm:$0xff]  ;;  %v63_v32 = vld [vmem:[#allocation5 + $0x90] sm:$0xff] }
  0x2f   :  { %v490_v30 = vpack.c.bf16 %v68_v28, %v64_v27  ;;  %v67_v33 = vld [vmem:[#allocation5 + $0xb0] sm:$0xff]  ;;  %v428_v34 = vpack.c.bf16 %v65_v31, %v61_v29  ;;  %v70_v35 = vld [vmem:[#allocation5 + $0xc8] sm:$0xff]  ;;  %v72_v37 = vld [vmem:[#allocation5 + $0xd8] sm:$0xff] }
  0x30   :  { %425 = vmatpush1.bf16.msra.mxu0 %v424_v21  ;;  %v74_v36 = vld [vmem:[#allocation5 + $0xe8] sm:$0xff]  ;;  %v492_v38 = vpack.c.bf16 %v67_v33, %v63_v32  ;;  %v76_v40 = vld [vmem:[#allocation5 + $0xf8] sm:$0xff]  ;;  %v69_v41 = vld [vmem:[#allocation5 + $0xc0] sm:$0xff] }
  0x31   :  { %489 = vmatpush1.bf16.msra.mxu1 %v488_v25  ;;  %427 = vmatprep.subr.bf16.mxu0 %v426_v26  ;;  %v430_v39 = vpack.c.bf16 %v74_v36, %v70_v35  ;;  %v73_v42 = vld [vmem:[#allocation5 + $0xe0] sm:$0xff]  ;;  %v494_v43 = vpack.c.bf16 %v76_v40, %v72_v37  ;;  %v71_v44 = vld [vmem:[#allocation5 + $0xd0] sm:$0xff]  ;;  %v78_v46 = vld [vmem:[#allocation5 + $0x108] sm:$0xff] }
  0x32   :  { %491 = vmatprep.subr.bf16.mxu1 %v490_v30  ;;  %v75_v45 = vld [vmem:[#allocation5 + $0xf0] sm:$0xff]  ;;  %v82_v47 = vld [vmem:[#allocation5 + $0x128] sm:$0xff]  ;;  %v80_v48 = vld [vmem:[#allocation5 + $0x118] sm:$0xff]  ;;  %v432_v50 = vpack.c.bf16 %v73_v42, %v69_v41 }
  0x33   :  { %v84_v49 = vld [vmem:[#allocation5 + $0x138] sm:$0xff]  ;;  %v496_v51 = vpack.c.bf16 %v75_v45, %v71_v44  ;;  %v434_v52 = vpack.c.bf16 %v82_v47, %v78_v46  ;;  %v77_v53 = vld [vmem:[#allocation5 + $0x100] sm:$0xff]  ;;  %v79_v55 = vld [vmem:[#allocation5 + $0x110] sm:$0xff] }
  0x34   :  { %429 = vmatpush1.bf16.msra.mxu0 %v428_v34  ;;  %v81_v54 = vld [vmem:[#allocation5 + $0x120] sm:$0xff]  ;;  %v498_v56 = vpack.c.bf16 %v84_v49, %v80_v48  ;;  %v83_v57 = vld [vmem:[#allocation5 + $0x130] sm:$0xff]  ;;  %v86_v58 = vld [vmem:[#allocation5 + $0x148] sm:$0xff] }
  0x35   :  { %493 = vmatpush1.bf16.msra.mxu1 %v492_v38  ;;  %431 = vmatprep.subr.bf16.mxu0 %v430_v39  ;;  %v90_v59 = vld [vmem:[#allocation5 + $0x168] sm:$0xff]  ;;  %v88_v60 = vld [vmem:[#allocation5 + $0x158] sm:$0xff]  ;;  %v436_v62 = vpack.c.bf16 %v81_v54, %v77_v53  ;;  %v500_v63 = vpack.c.bf16 %v83_v57, %v79_v55  ;;  %v85_v1 = vld [vmem:[#allocation5 + $0x140] sm:$0xff] }
  0x36   :  { %495 = vmatprep.subr.bf16.mxu1 %v494_v43  ;;  %v92_v61 = vld [vmem:[#allocation5 + $0x178] sm:$0xff]  ;;  %v438_v0 = vpack.c.bf16 %v90_v59, %v86_v58  ;;  %v89_v2 = vld [vmem:[#allocation5 + $0x160] sm:$0xff]  ;;  %v87_v3 = vld [vmem:[#allocation5 + $0x150] sm:$0xff] }
  0x37   :  { %v502_v4 = vpack.c.bf16 %v92_v61, %v88_v60  ;;  %v91_v5 = vld [vmem:[#allocation5 + $0x170] sm:$0xff]  ;;  %v94_v6 = vld [vmem:[#allocation5 + $0x188] sm:$0xff]  ;;  %v96_v8 = vld [vmem:[#allocation5 + $0x198] sm:$0xff]  ;;  %v440_v10 = vpack.c.bf16 %v89_v2, %v85_v1 }
  0x38   :  { %433 = vmatpush1.bf16.msra.mxu0 %v432_v50  ;;  %v98_v7 = vld [vmem:[#allocation5 + $0x1a8] sm:$0xff]  ;;  %v100_v9 = vld [vmem:[#allocation5 + $0x1b8] sm:$0xff]  ;;  %v504_v11 = vpack.c.bf16 %v91_v5, %v87_v3  ;;  %v93_v13 = vld [vmem:[#allocation5 + $0x180] sm:$0xff] }
  0x39   :  { %497 = vmatpush1.bf16.msra.mxu1 %v496_v51  ;;  %435 = vmatprep.subr.bf16.mxu0 %v434_v52  ;;  %v442_v12 = vpack.c.bf16 %v98_v7, %v94_v6  ;;  %v97_v14 = vld [vmem:[#allocation5 + $0x1a0] sm:$0xff]  ;;  %v95_v15 = vld [vmem:[#allocation5 + $0x190] sm:$0xff]  ;;  %v506_v16 = vpack.c.bf16 %v100_v9, %v96_v8  ;;  %v102_v18 = vld [vmem:[#allocation5 + $0x1c8] sm:$0xff] }
  0x3a   :  { %499 = vmatprep.subr.bf16.mxu1 %v498_v56  ;;  %v99_v17 = vld [vmem:[#allocation5 + $0x1b0] sm:$0xff]  ;;  %v106_v19 = vld [vmem:[#allocation5 + $0x1e8] sm:$0xff]  ;;  %v104_v20 = vld [vmem:[#allocation5 + $0x1d8] sm:$0xff]  ;;  %v444_v22 = vpack.c.bf16 %v97_v14, %v93_v13 }
  0x3b   :  { %v108_v21 = vld [vmem:[#allocation5 + $0x1f8] sm:$0xff]  ;;  %v508_v23 = vpack.c.bf16 %v99_v17, %v95_v15  ;;  %v446_v24 = vpack.c.bf16 %v106_v19, %v102_v18  ;;  %v101_v25 = vld [vmem:[#allocation5 + $0x1c0] sm:$0xff]  ;;  %v103_v27 = vld [vmem:[#allocation5 + $0x1d0] sm:$0xff] }
  0x3c   :  { %437 = vmatpush1.bf16.msra.mxu0 %v436_v62  ;;  %v105_v26 = vld [vmem:[#allocation5 + $0x1e0] sm:$0xff]  ;;  %v510_v28 = vpack.c.bf16 %v108_v21, %v104_v20  ;;  %v107_v29 = vld [vmem:[#allocation5 + $0x1f0] sm:$0xff]  ;;  %v110_v30 = vld [vmem:[#allocation5 + $0x208] sm:$0xff] }
  0x3d   :  { %501 = vmatpush1.bf16.msra.mxu1 %v500_v63  ;;  %439 = vmatprep.subr.bf16.mxu0 %v438_v0  ;;  %v114_v31 = vld [vmem:[#allocation5 + $0x228] sm:$0xff]  ;;  %v112_v32 = vld [vmem:[#allocation5 + $0x218] sm:$0xff]  ;;  %v448_v34 = vpack.c.bf16 %v105_v26, %v101_v25  ;;  %v512_v35 = vpack.c.bf16 %v107_v29, %v103_v27  ;;  %v109_v37 = vld [vmem:[#allocation5 + $0x200] sm:$0xff] }
  0x3e   :  { %503 = vmatprep.subr.bf16.mxu1 %v502_v4  ;;  %v116_v33 = vld [vmem:[#allocation5 + $0x238] sm:$0xff]  ;;  %v450_v36 = vpack.c.bf16 %v114_v31, %v110_v30  ;;  %v113_v38 = vld [vmem:[#allocation5 + $0x220] sm:$0xff]  ;;  %v111_v39 = vld [vmem:[#allocation5 + $0x210] sm:$0xff] }
  0x3f   :  { %v514_v40 = vpack.c.bf16 %v116_v33, %v112_v32  ;;  %v115_v41 = vld [vmem:[#allocation5 + $0x230] sm:$0xff]  ;;  %v118_v42 = vld [vmem:[#allocation5 + $0x248] sm:$0xff]  ;;  %v120_v44 = vld [vmem:[#allocation5 + $0x258] sm:$0xff]  ;;  %v452_v46 = vpack.c.bf16 %v113_v38, %v109_v37 }
  0x40   :  { %441 = vmatpush1.bf16.msra.mxu0 %v440_v10  ;;  %v122_v43 = vld [vmem:[#allocation5 + $0x268] sm:$0xff]  ;;  %v124_v45 = vld [vmem:[#allocation5 + $0x278] sm:$0xff]  ;;  %v516_v47 = vpack.c.bf16 %v115_v41, %v111_v39  ;;  %v117_v49 = vld [vmem:[#allocation5 + $0x240] sm:$0xff] }
  0x41   :  { %505 = vmatpush1.bf16.msra.mxu1 %v504_v11  ;;  %443 = vmatprep.subr.bf16.mxu0 %v442_v12  ;;  %v454_v48 = vpack.c.bf16 %v122_v43, %v118_v42  ;;  %v121_v50 = vld [vmem:[#allocation5 + $0x260] sm:$0xff]  ;;  %v119_v51 = vld [vmem:[#allocation5 + $0x250] sm:$0xff]  ;;  %v518_v52 = vpack.c.bf16 %v124_v45, %v120_v44  ;;  %v126_v54 = vld [vmem:[#allocation5 + $0x288] sm:$0xff] }
  0x42   :  { %507 = vmatprep.subr.bf16.mxu1 %v506_v16  ;;  %v123_v53 = vld [vmem:[#allocation5 + $0x270] sm:$0xff]  ;;  %v130_v55 = vld [vmem:[#allocation5 + $0x2a8] sm:$0xff]  ;;  %v128_v56 = vld [vmem:[#allocation5 + $0x298] sm:$0xff]  ;;  %v456_v58 = vpack.c.bf16 %v121_v50, %v117_v49 }
  0x43   :  { %v132_v57 = vld [vmem:[#allocation5 + $0x2b8] sm:$0xff]  ;;  %v520_v59 = vpack.c.bf16 %v123_v53, %v119_v51  ;;  %v458_v60 = vpack.c.bf16 %v130_v55, %v126_v54  ;;  %v125_v61 = vld [vmem:[#allocation5 + $0x280] sm:$0xff]  ;;  %v127_v63 = vld [vmem:[#allocation5 + $0x290] sm:$0xff] }
  0x44   :  { %445 = vmatpush1.bf16.msra.mxu0 %v444_v22  ;;  %v129_v62 = vld [vmem:[#allocation5 + $0x2a0] sm:$0xff]  ;;  %v522_v0 = vpack.c.bf16 %v132_v57, %v128_v56  ;;  %v131_v1 = vld [vmem:[#allocation5 + $0x2b0] sm:$0xff]  ;;  %v134_v2 = vld [vmem:[#allocation5 + $0x2c8] sm:$0xff] }
  0x45   :  { %509 = vmatpush1.bf16.msra.mxu1 %v508_v23  ;;  %447 = vmatprep.subr.bf16.mxu0 %v446_v24  ;;  %v138_v3 = vld [vmem:[#allocation5 + $0x2e8] sm:$0xff]  ;;  %v136_v4 = vld [vmem:[#allocation5 + $0x2d8] sm:$0xff]  ;;  %v460_v6 = vpack.c.bf16 %v129_v62, %v125_v61  ;;  %v133_v7 = vld [vmem:[#allocation5 + $0x2c0] sm:$0xff]  ;;  %v524_v8 = vpack.c.bf16 %v131_v1, %v127_v63 }
  0x46   :  { %511 = vmatprep.subr.bf16.mxu1 %v510_v28  ;;  %v140_v5 = vld [vmem:[#allocation5 + $0x2f8] sm:$0xff]  ;;  %v462_v9 = vpack.c.bf16 %v138_v3, %v134_v2  ;;  %v137_v10 = vld [vmem:[#allocation5 + $0x2e0] sm:$0xff]  ;;  %v135_v11 = vld [vmem:[#allocation5 + $0x2d0] sm:$0xff]  ;;  %v175_v2 = vlaneseq }
  0x47   :  { %v139_v12 = vld [vmem:[#allocation5 + $0x2f0] sm:$0xff]  ;;  %v526_v13 = vpack.c.bf16 %v140_v5, %v136_v4  ;;  %v142_v14 = vld [vmem:[#allocation5 + $0x308] sm:$0xff]  ;;  %v716_v16 = vld.sshfl [vmem:[#allocation2] sm:$0x33 pattern:$0x76325410]  ;;  %v464_v20 = vpack.c.bf16 %v137_v10, %v133_v7 }
  0x48   :  { %449 = vmatpush1.bf16.msra.mxu0 %v448_v34  ;;  %v146_v15 = vld [vmem:[#allocation5 + $0x328] sm:$0xff]  ;;  %v144_v17 = vld [vmem:[#allocation5 + $0x318] sm:$0xff]  ;;  %v203_v19 = vcombine.high %v716_v16, %v716_v16  ;;  %v528_v21 = vpack.c.bf16 %v139_v12, %v135_v11  ;;  %v141_v23 = vld [vmem:[#allocation5 + $0x300] sm:$0xff]  ;;  %v176_v3 = vshrl.u32 %v175_v2, 7  ;;  %v657_v7 = vmov 1983009808  }
  0x49   :  { %513 = vmatpush1.bf16.msra.mxu1 %v512_v35  ;;  %451 = vmatprep.subr.bf16.mxu0 %v450_v36  ;;  %v148_v18 = vld [vmem:[#allocation5 + $0x338] sm:$0xff]  ;;  %v466_v22 = vpack.c.bf16 %v146_v15, %v142_v14  ;;  %v145_v24 = vld [vmem:[#allocation5 + $0x320] sm:$0xff]  ;;  %v143_v25 = vld [vmem:[#allocation5 + $0x310] sm:$0xff] }
  0x4a   :  { %515 = vmatprep.subr.bf16.mxu1 %v514_v40  ;;  %v530_v26 = vpack.c.bf16 %v148_v18, %v144_v17  ;;  %v147_v27 = vld [vmem:[#allocation5 + $0x330] sm:$0xff]  ;;  %v150_v28 = vld [vmem:[#allocation5 + $0x348] sm:$0xff]  ;;  %270 = vmatprep.mubr.f32.mxu0 %v203_v19  ;;  %v152_v30 = vld [vmem:[#allocation5 + $0x358] sm:$0xff]  ;;  %v468_v32 = vpack.c.bf16 %v145_v24, %v141_v23  ;;  %v177_v4 = vsub.s32 0, %v176_v3  ;;  %v189_v10 = vsub.s32 3, %v176_v3 }
  0x4b   :  { %v154_v29 = vld [vmem:[#allocation5 + $0x368] sm:$0xff]  ;;  %v156_v31 = vld [vmem:[#allocation5 + $0x378] sm:$0xff]  ;;  %341 = vmatprep.mubr.f32.mxu1 %v203_v19  ;;  %v532_v33 = vpack.c.bf16 %v147_v27, %v143_v25  ;;  %v149_v35 = vld [vmem:[#allocation5 + $0x340] sm:$0xff] }
  0x4c   :  { %453 = vmatpush1.bf16.msra.mxu0 %v452_v46  ;;  %v470_v34 = vpack.c.bf16 %v154_v29, %v150_v28  ;;  %v153_v36 = vld [vmem:[#allocation5 + $0x360] sm:$0xff]  ;;  %v151_v37 = vld [vmem:[#allocation5 + $0x350] sm:$0xff]  ;;  %v534_v38 = vpack.c.bf16 %v156_v31, %v152_v30  ;;  %v158_v40 = vld [vmem:[#allocation5 + $0x388] sm:$0xff] }
  0x4d   :  { %517 = vmatpush1.bf16.msra.mxu1 %v516_v47  ;;  %455 = vmatprep.subr.bf16.mxu0 %v454_v48  ;;  %v155_v39 = vld [vmem:[#allocation5 + $0x370] sm:$0xff]  ;;  %v162_v41 = vld [vmem:[#allocation5 + $0x3a8] sm:$0xff]  ;;  %v160_v42 = vld [vmem:[#allocation5 + $0x398] sm:$0xff]  ;;  %v472_v44 = vpack.c.bf16 %v153_v36, %v149_v35 }
  0x4e   :  { %519 = vmatprep.subr.bf16.mxu1 %v518_v52  ;;  %v164_v43 = vld [vmem:[#allocation5 + $0x3b8] sm:$0xff]  ;;  %v536_v45 = vpack.c.bf16 %v155_v39, %v151_v37  ;;  %v474_v46 = vpack.c.bf16 %v162_v41, %v158_v40  ;;  %v157_v47 = vld [vmem:[#allocation5 + $0x380] sm:$0xff]  ;;  %v159_v49 = vld [vmem:[#allocation5 + $0x390] sm:$0xff] }
  0x4f   :  { %v161_v48 = vld [vmem:[#allocation5 + $0x3a0] sm:$0xff]  ;;  %v538_v50 = vpack.c.bf16 %v164_v43, %v160_v42  ;;  %v163_v51 = vld [vmem:[#allocation5 + $0x3b0] sm:$0xff]  ;;  %v166_v52 = vld [vmem:[#allocation5 + $0x3c8] sm:$0xff] }
  0x50   :  { %457 = vmatpush1.bf16.msra.mxu0 %v456_v58  ;;  %v170_v53 = vld [vmem:[#allocation5 + $0x3e8] sm:$0xff]  ;;  %v168_v54 = vld [vmem:[#allocation5 + $0x3d8] sm:$0xff]  ;;  %v476_v56 = vpack.c.bf16 %v161_v48, %v157_v47  ;;  %v540_v57 = vpack.c.bf16 %v163_v51, %v159_v49  ;;  %v167_v62 = vld [vmem:[#allocation5 + $0x3d0] sm:$0xff] }
  0x51   :  { %521 = vmatpush1.bf16.msra.mxu1 %v520_v59  ;;  %459 = vmatprep.subr.bf16.mxu0 %v458_v60  ;;  %v172_v55 = vld [vmem:[#allocation5 + $0x3f8] sm:$0xff]  ;;  %v478_v58 = vpack.c.bf16 %v170_v53, %v166_v52  ;;  %v165_v59 = vld [vmem:[#allocation5 + $0x3c0] sm:$0xff]  ;;  %v171_v63 = vld [vmem:[#allocation5 + $0x3f0] sm:$0xff] }
  0x52   :  { %523 = vmatprep.subr.bf16.mxu1 %v522_v0  ;;  %v169_v60 = vld [vmem:[#allocation5 + $0x3e0] sm:$0xff]  ;;  %v542_v61 = vpack.c.bf16 %v172_v55, %v168_v54  ;;  %v544_v1 = vpack.c.bf16 %v171_v63, %v167_v62  ;;  %v173_v5 = vld [vmem:[%s754_s2] sm:$0xf]  ;;  %vm370_vm3 = vmor %vm369_vm1, %vm368_vm0  ;;  %s658_s2 = smov [#allocation7]  }
  0x53   :  { %v480_v0 = vpack.c.bf16 %v169_v60, %v165_v59  ;;  %v178_v11 = vrot.slane %v173_v5, %v177_v4  ;;  %v190_v15 = vrot.slane %v173_v5, %v189_v10  ;;  %vm372_vm5 = vmor %vm371_vm4, %vm370_vm3  ;;  %s393_s15 = sshll.u32 %s658_s2, 4  ;;  %s394_s15 = int_to_ptr.vmem [resolvable:$true] %s393_s15 }
  0x54   :  { %461 = vmatpush1.bf16.msra.mxu0 %v460_v6  ;;  %v185_v6 = vsub.s32 2, %v176_v3  ;;  %s601_s16 = scalar_lea.vmem %s394_s15, 96  ;;  %p606_p3 = scmp.lt.s32.totalorder %s394_s15, %s394_s15 }
  0x55   :  { %525 = vmatpush1.bf16.msra.mxu1 %v524_v8  ;;  %463 = vmatprep.subr.bf16.mxu0 %v462_v9  ;;  %v353_v8 = vunpack.c.l.s4 %v657_v7  ;;  %v181_v9 = vsub.s32 1, %v176_v3  ;;  %p602_p2 = scmp.ne.s32.totalorder %s394_s15, %s601_s16  ;;  %p607_p4 = scmp.lt.s32.totalorder %s601_s16, %s601_s16 }
  0x56   :  { %527 = vmatprep.subr.bf16.mxu1 %v526_v13  ;;  %v186_v12 = vrot.slane %v173_v5, %v185_v6 }
  0x57   :  { %v354_v13 = vunpack.c.0.s8 %v353_v8  ;;  %v182_v14 = vrot.slane %v173_v5, %v181_v9  ;;  %p608_p5 = por %p607_p4, %p606_p3 }
  0x58   :  { %465 = vmatpush1.bf16.msra.mxu0 %v464_v20 }
  0x59   :  { %529 = vmatpush1.bf16.msra.mxu1 %v528_v21  ;;  %467 = vmatprep.subr.bf16.mxu0 %v466_v22  ;;  %v357_v21 = vsub.s32 %v354_v13, %v176_v3  ;;  %p609_p6 = pnand %p608_p5, %p602_p2 }
  0x5a   :  { %531 = vmatprep.subr.bf16.mxu1 %v530_v26 }
  0x5c   :  { %469 = vmatpush1.bf16.msra.mxu0 %v468_v32 }
  0x5d   :  { %533 = vmatpush1.bf16.msra.mxu1 %v532_v33  ;;  %471 = vmatprep.subr.bf16.mxu0 %v470_v34 }
  0x5e   :  { %535 = vmatprep.subr.bf16.mxu1 %v534_v38 }
  0x60   :  { %473 = vmatpush1.bf16.msra.mxu0 %v472_v44 }
  0x61   :  { %537 = vmatpush1.bf16.msra.mxu1 %v536_v45  ;;  %475 = vmatprep.subr.bf16.mxu0 %v474_v46 }
  0x62   :  { %539 = vmatprep.subr.bf16.mxu1 %v538_v50 }
  0x64   :  { %477 = vmatpush1.bf16.msra.mxu0 %v476_v56 }
  0x65   :  { %541 = vmatpush1.bf16.msra.mxu1 %v540_v57  ;;  %479 = vmatprep.subr.bf16.mxu0 %v478_v58 }
  0x66   :  { %543 = vmatprep.subr.bf16.mxu1 %v542_v61 }
  0x68   :  { %481 = vmatpush1.bf16.msra.mxu0 %v480_v0 }
  0x69   :  { %545 = vmatpush1.bf16.msra.mxu1 %v544_v1 }
  0x6b   :  { %271 = vmatmul.mubr.f32.vlgmr.msra.gmra.mrb[0].mxu0 %v716_v16 }
  0x6c   :  { %342 = vmatmul.mubr.f32.vlgmr.msra.gmra.mrb[0].mxu1 %v716_v16 }
 0x13e   :  { %v272_v17 = vpop.f32.mrb[0].mxu0 }
 0x13f   :  { %v273_v18 = vadd.f32 %v272_v17, %v178_v11  ;;  %v343_v16 = vpop.f32.mrb[0].mxu1  ;;  %v274_v19 = vpop.f32.mrb[1].mxu0 }
 0x140   :  { %v344_v20 = vadd.f32 %v343_v16, %v186_v12  ;;  %v275_v22 = vadd.f32 %v274_v19, %v182_v14  ;;  %v345_v23 = vpop.f32.mrb[1].mxu1 }
 0x141   :  { %v346_v24 = vadd.f32 %v345_v23, %v190_v15 }
 0x142   :  { %v351_v25 = vcombine.low %v273_v18, %v275_v22  ;;  %v365_v27 = vrot.slane %v344_v20, %v357_v21 }
 0x143   :  { %v375_v26 = vsel %vm374_vm2, %v346_v24, -inf }
 0x144   :  { %v358_v28 = vrot.slane %v351_v25, %v357_v21  ;;  %376 = vmax.xlane.f32.xlu0 %v375_v26 }
 0x146   :  { %v366_v29 = vcombine.low %v358_v28, %v365_v27 }
 0x148   :  { %373 = vst.msk [vmem:[#allocation7] sm:$0x3f] %vm372_vm5, %v366_v29 }
 0x1d1   :  { %v377_v30 = vpop.xlane.xlu0 %376 }
 0x1d2   :  { %v378_v31 = vsub.f32 %v346_v24, %v377_v30 }
 0x1d4   :  { %v379_v32 = vmul.f32 1.442695, %v378_v31 }
 0x1d6   :  { %553 = vpow2.f32 %v379_v32 }
 0x1e0   :  { %v554_v33 = vpop.eup %553 }
 0x1e1   :  { %v381_v34 = vsel %vm374_vm2, %v554_v33, 0.0 }
 0x1e2   :  { %382 = vadd.xlane.f32.xlu0 %v381_v34 }
 0x1e3   :  { %612 = shalt.err (!%p609_p6)
}
 0x1e4   :  { %s613_s19 = scalar_lea.hbm %s755_s3, 96 }
 0x1e5   :  { %p614_p7 = scmp.ne.s32.totalorder %s755_s3, %s613_s19  ;;  %p617_p8 = scmp.lt.u32.totalorder %s613_s19, %s755_s3 }
 0x1e7   :  { %p619_p9 = pnand %p617_p8, %p614_p7 }
 0x1e9   :  { %622 = shalt.err (!%p619_p9)
}
 0x1ea   :  { %396 = dma.vmem_to_hbm [thread:$0]  %s394_s15, 96, %s755_s3, [#allocation4]  }
 0x1eb   :  { %s659_s26 = smov [#allocation8]  }
 0x1ec   :  { %s403_s27 = sshll.u32 %s659_s26, 4  ;;  %s404_s27 = int_to_ptr.vmem [resolvable:$true] %s403_s27 }
 0x1ed   :  { %s623_s28 = scalar_lea.vmem %s404_s27, 32  ;;  %p628_p11 = scmp.lt.s32.totalorder %s404_s27, %s404_s27 }
 0x1ee   :  { %p624_p10 = scmp.ne.s32.totalorder %s404_s27, %s623_s28  ;;  %p629_p12 = scmp.lt.s32.totalorder %s623_s28, %s623_s28 }
 0x1f0   :  { %p630_p13 = por %p629_p12, %p628_p11 }
 0x1f2   :  { %p631_p0 = pnand %p630_p13, %p624_p10 }
 0x26f   :  { %v383_v35 = vpop.xlane.xlu0 %382 }
 0x270   :  { %555 = vrcp.f32 %v383_v35 }
 0x27a   :  { %v556_v36 = vpop.eup %555 }
 0x27b   :  { %v385_v37 = vmul.f32 %v556_v36, %v554_v33 }
 0x27d   :  { %386 = vst.msk [vmem:[#allocation8] sm:$0x3] %vm374_vm2, %v385_v37 }
 0x27e   :  { %634 = shalt.err (!%p631_p0)
}
 0x27f   :  { %s635_s3 = scalar_lea.hbm %s756_s4, 32 }
 0x280   :  { %p636_p1 = scmp.ne.s32.totalorder %s756_s4, %s635_s3  ;;  %p639_p2 = scmp.lt.u32.totalorder %s635_s3, %s756_s4 }
 0x282   :  { %p641_p3 = pnand %p639_p2, %p636_p1 }
 0x284   :  { %644 = shalt.err (!%p641_p3)
}
 0x285   :  { %406 = dma.vmem_to_hbm [thread:$0]  %s404_s27, 32, %s756_s4, [#allocation9]  }
 0x286   :  { %649 = dma.done.wait [#allocation4], 96  }
 0x287   :  { %650 = vsyncadd [#allocation4], 4294967200 }
 0x288   :  { %651 = dma.done.wait [#allocation9], 32  }
 0x289   :  { %652 = vsyncadd [#allocation9], 4294967264 }
 0x28a   :  { %413 = vsyncpa [#allocation3], 1 }
 0x28b   :  { %414 = vsyncpa [#allocation6], 1 }
 0x28c   :  { %415 = vsyncpa [#allocation4], 1 }
 0x28d   :  { %416 = vsyncpa [#allocation9], 1 }

</bundles_post_ra>
